<compile_context>
chip_gen: v6e
topology: v6e:2x2x1
jax: 0.10.0
libtpu: 0.0.40
codegen_flags: <defaults>
</compile_context>

<pallas_src>
import jax
import jax.numpy as jnp
from jax.experimental import pallas as pl
from jax.experimental.pallas import tpu as pltpu


# ----------------------------- Pallas kernel -------------------------------
def _convkb_kernel(conv_w_ref, conv_b_ref, fc_b_ref, fc_wT_ref,
                   head_ref, rel_ref, tail_ref, out_ref):
    tile_n = head_ref.shape[0]
    num_ch = fc_wT_ref.shape[1]            # static (out_channels)

    # Accumulator column initialized with the fc bias.
    score = jnp.full((tile_n, 1), fc_b_ref[0], jnp.float32)

    # TODO(synk): for large out_channels (C >~ 32) switch this fully-unrolled
    # loop to lax.fori_loop(..., unroll=4-8) to bound code size / live ranges.
    for ch in range(num_ch):
        # Per-channel "conv" is pure elementwise VPU work over the (tile_n, D)
        # slabs; scalar weights come from SMEM.
        conv = (conv_w_ref[ch, 0] * head_ref[...]
                + conv_w_ref[ch, 1] * rel_ref[...]
                + conv_w_ref[ch, 2] * tail_ref[...]
                + conv_b_ref[ch])
        act = jnp.maximum(conv, 0.0)
        # TODO(synk): nn.Dropout skipped (identity in eval/inference forward).
        # fc_w weighting + D-reduction as an MXU matvec (f32 accumulate):
        # frees VALU slots and the XLU cross-lane reduce.
        score = score + jnp.dot(act, fc_wT_ref[:, ch:ch + 1],
                                preferred_element_type=jnp.float32)

    out_ref[...] = score.astype(out_ref.dtype)


# ----------------------------- wrapper --------------------------------------
def _round_up(x, m):
    return (x + m - 1) // m * m


# Double-buffered input-slab budget; conservative for v7x (64 MiB physical VMEM,
# 32 MiB default scoped). v5e/v6e have 128 MiB so this only matters for huge D.
_VMEM_BUDGET_BYTES = 24 * 1024 * 1024
_VMEM_LIMIT_BYTES = 48 * 1024 * 1024
_MIN_GRID_STEPS = 8        # >= 4 steps per TensorCore on dual-TC v7x


def _pick_tile_n(n, d, itemsize, max_tile):
    tile = min(_round_up(max(n, 1), 8), max_tile)
    # VMEM bound: 3 row-slab inputs, double-buffered by the Pallas pipeline.
    while tile > 8 and 3 * 2 * tile * d * itemsize > _VMEM_BUDGET_BYTES:
        tile = _round_up(tile // 2, 8)
    # Keep enough grid steps for megacore sharding / pipeline overlap, but only
    # when N is large enough that per-step overhead stays negligible.
    min_split = _round_up(pl.cdiv(n, _MIN_GRID_STEPS), 8)
    if min_split >= 256:
        tile = min(tile, min_split)
    return max(tile, 8)


def convkb_score_pallas(head, rel, tail, conv_w, conv_b, fc_w, fc_b,
                        *, max_tile_n=2048):
    n, d = head.shape
    assert d % 128 == 0, "feature dim must be lane aligned (multiple of 128)"
    c = fc_w.shape[0]

    head = head.astype(jnp.float32)
    rel = rel.astype(jnp.float32)
    tail = tail.astype(jnp.float32)
    conv_w = conv_w.astype(jnp.float32)
    conv_b = conv_b.astype(jnp.float32)
    fc_b = fc_b.astype(jnp.float32)
    fc_wT = fc_w.astype(jnp.float32).T          # (D, C): static lane-slices in kernel

    tile_n = _pick_tile_n(n, d, 4, max_tile_n)
    grid = (pl.cdiv(n, tile_n),)                # ragged last block handled by Pallas

    row_spec = pl.BlockSpec((tile_n, d), lambda i: (i, 0))
    smem_spec = pl.BlockSpec(memory_space=pltpu.MemorySpace.SMEM)

    out = pl.pallas_call(
        _convkb_kernel,
        out_shape=jax.ShapeDtypeStruct((n, 1), jnp.float32),
        grid_spec=pltpu.PrefetchScalarGridSpec(
            num_scalar_prefetch=0,
            grid=grid,
            in_specs=[
                smem_spec,                               # conv_w (C, 3)
                smem_spec,                               # conv_b (C,)
                smem_spec,                               # fc_b   (1,)
                pl.BlockSpec((d, c), lambda i: (0, 0)),  # fc_wT  (D, C), revisited
                row_spec, row_spec, row_spec,            # head / rel / tail tiles
            ],
            out_specs=pl.BlockSpec((tile_n, 1), lambda i: (i, 0)),
        ),
        compiler_params=pltpu.CompilerParams(
            dimension_semantics=("parallel",),           # independent tiles
            vmem_limit_bytes=_VMEM_LIMIT_BYTES,
        ),
    )(conv_w, conv_b, fc_b, fc_wT, head, rel, tail)
    return out


def only_convkb_forward(params, batch_inputs):
    # TODO(synk): gather still materialized by XLA; fusing it into the kernel
    # via scalar-prefetched indices + pl.ANY tables would halve HBM traffic.
    head = params["entity"][batch_inputs[:, 0]]
    rel = params["relation"][batch_inputs[:, 1]]
    tail = params["entity"][batch_inputs[:, 2]]
    return convkb_score_pallas(head, rel, tail,
                               params["conv_w"], params["conv_b"],
                               params["fc_w"], params["fc_b"])


# ----------------------------- pure-JAX reference ----------------------------
def only_convkb_forward_ref(params, batch_inputs):
    head = params["entity"][batch_inputs[:, 0]]
    rel = params["relation"][batch_inputs[:, 1]]
    tail = params["entity"][batch_inputs[:, 2]]
    x = jnp.stack([head, rel, tail], axis=-1)                        # (N, D, 3)
    conv = (jnp.einsum("ndj,cj->ncd", x, params["conv_w"])
            + params["conv_b"][None, :, None])                       # (N, C, D)
    act = jnp.maximum(conv, 0.0)
    score = jnp.einsum("ncd,cd->n", act, params["fc_w"]) + params["fc_b"][0]
    return score[:, None]                                            # (N, 1)


# ----------------------------- main ------------------------------------------
if __name__ == "__main__":
    NUM_ENTITIES = 20
    NUM_RELATIONS = 6
    DIM = 64
    N_HEADS = 2                      # feature dim D = DIM * N_HEADS = 128
    OUT_CHANNELS = 4
    BATCH = 24

    D = DIM * N_HEADS
    key = jax.random.PRNGKey(0)
    k_e, k_r, k_cw, k_cb, k_fw, k_fb, k_h, k_rl, k_t = jax.random.split(key, 9)

    params = {
        "entity": jax.random.normal(k_e, (NUM_ENTITIES, D), jnp.float32),
        "relation": jax.random.normal(k_r, (NUM_RELATIONS, D), jnp.float32),
        # Conv2d(1, C, (1,3)) weight (C,1,1,3) stored flattened as (C, 3).
        "conv_w": 0.3 * jax.random.normal(k_cw, (OUT_CHANNELS, 3), jnp.float32),
        "conv_b": 0.1 * jax.random.normal(k_cb, (OUT_CHANNELS,), jnp.float32),
        # Linear(C*D, 1) weight (1, C*D) stored channel-major as (C, D).
        "fc_w": 0.05 * jax.random.normal(k_fw, (OUT_CHANNELS, D), jnp.float32),
        "fc_b": 0.1 * jax.random.normal(k_fb, (1,), jnp.float32),
    }

    heads = jax.random.randint(k_h, (BATCH, 1), 0, NUM_ENTITIES, jnp.int32)
    rels = jax.random.randint(k_rl, (BATCH, 1), 0, NUM_RELATIONS, jnp.int32)
    tails = jax.random.randint(k_t, (BATCH, 1), 0, NUM_ENTITIES, jnp.int32)
    batch_inputs = jnp.concatenate([heads, rels, tails], axis=1)     # (24, 3)

    out = jax.block_until_ready(only_convkb_forward(params, batch_inputs))
    out_ref = jax.block_until_ready(only_convkb_forward_ref(params, batch_inputs))

    assert out.shape == (BATCH, 1), out.shape
    assert jnp.allclose(out, out_ref, rtol=2e-3, atol=2e-3), (out, out_ref)

    print("KERNEL_OK")
</pallas_src>

<mosaic_0001>
module attributes {stable_mosaic.version = 11 : i64} {
  func.func @_convkb_kernel(%arg0: i32, %arg1: memref<4x3xf32, #tpu.memory_space<smem>>, %arg2: memref<4xf32, #tpu.memory_space<smem>>, %arg3: memref<1xf32, #tpu.memory_space<smem>>, %arg4: memref<128x4xf32, #tpu.memory_space<vmem>>, %arg5: memref<24x128xf32, #tpu.memory_space<vmem>>, %arg6: memref<24x128xf32, #tpu.memory_space<vmem>>, %arg7: memref<24x128xf32, #tpu.memory_space<vmem>>, %arg8: memref<24x1xf32, #tpu.memory_space<vmem>>) attributes {dimension_semantics = [#tpu.dimension_semantics<parallel>], iteration_bounds = array<i64: 1>, scalar_prefetch = 0 : i64, scratch_operands = 0 : i64, tpu.core_type = #tpu.core_type<tc>, window_params = [{transform_indices = @transform_0, window_bounds = array<i64: 4, 3>}, {transform_indices = @transform_1, window_bounds = array<i64: 4>}, {transform_indices = @transform_2, window_bounds = array<i64: 1>}, {pipeline_mode = #tpu.pipeline_mode<synchronous>, transform_indices = @transform_3, window_bounds = array<i64: 128, 4>}, {transform_indices = @transform_4, window_bounds = array<i64: 24, 128>}, {transform_indices = @transform_5, window_bounds = array<i64: 24, 128>}, {transform_indices = @transform_6, window_bounds = array<i64: 24, 128>}, {transform_indices = @transform_7, window_bounds = array<i64: 24, 1>}]} {
    %c0 = arith.constant 0 : index
    %0 = memref.load %arg3[%c0] : memref<1xf32, #tpu.memory_space<smem>>
    %1 = vector.broadcast %0 : f32 to vector<24x1xf32>
    %c0_0 = arith.constant 0 : index
    %c0_1 = arith.constant 0 : index
    %2 = memref.load %arg1[%c0_0, %c0_1] : memref<4x3xf32, #tpu.memory_space<smem>>
    %c0_2 = arith.constant 0 : index
    %c0_3 = arith.constant 0 : index
    %3 = vector.load %arg5[%c0_2, %c0_3] : memref<24x128xf32, #tpu.memory_space<vmem>>, vector<24x128xf32>
    %4 = vector.broadcast %2 : f32 to vector<24x128xf32>
    %5 = arith.mulf %4, %3 : vector<24x128xf32>
    %c0_4 = arith.constant 0 : index
    %c1 = arith.constant 1 : index
    %6 = memref.load %arg1[%c0_4, %c1] : memref<4x3xf32, #tpu.memory_space<smem>>
    %c0_5 = arith.constant 0 : index
    %c0_6 = arith.constant 0 : index
    %7 = vector.load %arg6[%c0_5, %c0_6] : memref<24x128xf32, #tpu.memory_space<vmem>>, vector<24x128xf32>
    %8 = vector.broadcast %6 : f32 to vector<24x128xf32>
    %9 = arith.mulf %8, %7 : vector<24x128xf32>
    %10 = arith.addf %5, %9 : vector<24x128xf32>
    %c0_7 = arith.constant 0 : index
    %c2 = arith.constant 2 : index
    %11 = memref.load %arg1[%c0_7, %c2] : memref<4x3xf32, #tpu.memory_space<smem>>
    %c0_8 = arith.constant 0 : index
    %c0_9 = arith.constant 0 : index
    %12 = vector.load %arg7[%c0_8, %c0_9] : memref<24x128xf32, #tpu.memory_space<vmem>>, vector<24x128xf32>
    %13 = vector.broadcast %11 : f32 to vector<24x128xf32>
    %14 = arith.mulf %13, %12 : vector<24x128xf32>
    %15 = arith.addf %10, %14 : vector<24x128xf32>
    %c0_10 = arith.constant 0 : index
    %16 = memref.load %arg2[%c0_10] : memref<4xf32, #tpu.memory_space<smem>>
    %17 = vector.broadcast %16 : f32 to vector<24x128xf32>
    %18 = arith.addf %15, %17 : vector<24x128xf32>
    %cst = arith.constant 0.000000e+00 : f32
    %19 = vector.broadcast %cst : f32 to vector<24x128xf32>
    %20 = arith.maximumf %18, %19 : vector<24x128xf32>
    %c0_11 = arith.constant 0 : index
    %c0_12 = arith.constant 0 : index
    %21 = vector.load %arg4[%c0_11, %c0_12] : memref<128x4xf32, #tpu.memory_space<vmem>>, vector<128x1xf32>
    %cst_13 = arith.constant dense<0.000000e+00> : vector<24x1xf32>
    %22 = tpu.matmul %20, %21, %cst_13 {dimension_numbers = #tpu.dot_dimension_numbers<[1], [0], [0], [1], [0, 0, 1, 1], [], []>} : vector<24x128xf32>, vector<128x1xf32>, vector<24x1xf32> -> vector<24x1xf32>
    %23 = arith.addf %1, %22 : vector<24x1xf32>
    %c1_14 = arith.constant 1 : index
    %c0_15 = arith.constant 0 : index
    %24 = memref.load %arg1[%c1_14, %c0_15] : memref<4x3xf32, #tpu.memory_space<smem>>
    %c0_16 = arith.constant 0 : index
    %c0_17 = arith.constant 0 : index
    %25 = vector.load %arg5[%c0_16, %c0_17] : memref<24x128xf32, #tpu.memory_space<vmem>>, vector<24x128xf32>
    %26 = vector.broadcast %24 : f32 to vector<24x128xf32>
    %27 = arith.mulf %26, %25 : vector<24x128xf32>
    %c1_18 = arith.constant 1 : index
    %c1_19 = arith.constant 1 : index
    %28 = memref.load %arg1[%c1_18, %c1_19] : memref<4x3xf32, #tpu.memory_space<smem>>
    %c0_20 = arith.constant 0 : index
    %c0_21 = arith.constant 0 : index
    %29 = vector.load %arg6[%c0_20, %c0_21] : memref<24x128xf32, #tpu.memory_space<vmem>>, vector<24x128xf32>
    %30 = vector.broadcast %28 : f32 to vector<24x128xf32>
    %31 = arith.mulf %30, %29 : vector<24x128xf32>
    %32 = arith.addf %27, %31 : vector<24x128xf32>
    %c1_22 = arith.constant 1 : index
    %c2_23 = arith.constant 2 : index
    %33 = memref.load %arg1[%c1_22, %c2_23] : memref<4x3xf32, #tpu.memory_space<smem>>
    %c0_24 = arith.constant 0 : index
    %c0_25 = arith.constant 0 : index
    %34 = vector.load %arg7[%c0_24, %c0_25] : memref<24x128xf32, #tpu.memory_space<vmem>>, vector<24x128xf32>
    %35 = vector.broadcast %33 : f32 to vector<24x128xf32>
    %36 = arith.mulf %35, %34 : vector<24x128xf32>
    %37 = arith.addf %32, %36 : vector<24x128xf32>
    %c1_26 = arith.constant 1 : index
    %38 = memref.load %arg2[%c1_26] : memref<4xf32, #tpu.memory_space<smem>>
    %39 = vector.broadcast %38 : f32 to vector<24x128xf32>
    %40 = arith.addf %37, %39 : vector<24x128xf32>
    %cst_27 = arith.constant 0.000000e+00 : f32
    %41 = vector.broadcast %cst_27 : f32 to vector<24x128xf32>
    %42 = arith.maximumf %40, %41 : vector<24x128xf32>
    %c0_28 = arith.constant 0 : index
    %c1_29 = arith.constant 1 : index
    %43 = vector.load %arg4[%c0_28, %c1_29] : memref<128x4xf32, #tpu.memory_space<vmem>>, vector<128x1xf32>
    %cst_30 = arith.constant dense<0.000000e+00> : vector<24x1xf32>
    %44 = tpu.matmul %42, %43, %cst_30 {dimension_numbers = #tpu.dot_dimension_numbers<[1], [0], [0], [1], [0, 0, 1, 1], [], []>} : vector<24x128xf32>, vector<128x1xf32>, vector<24x1xf32> -> vector<24x1xf32>
    %45 = arith.addf %23, %44 : vector<24x1xf32>
    %c2_31 = arith.constant 2 : index
    %c0_32 = arith.constant 0 : index
    %46 = memref.load %arg1[%c2_31, %c0_32] : memref<4x3xf32, #tpu.memory_space<smem>>
    %c0_33 = arith.constant 0 : index
    %c0_34 = arith.constant 0 : index
    %47 = vector.load %arg5[%c0_33, %c0_34] : memref<24x128xf32, #tpu.memory_space<vmem>>, vector<24x128xf32>
    %48 = vector.broadcast %46 : f32 to vector<24x128xf32>
    %49 = arith.mulf %48, %47 : vector<24x128xf32>
    %c2_35 = arith.constant 2 : index
    %c1_36 = arith.constant 1 : index
    %50 = memref.load %arg1[%c2_35, %c1_36] : memref<4x3xf32, #tpu.memory_space<smem>>
    %c0_37 = arith.constant 0 : index
    %c0_38 = arith.constant 0 : index
    %51 = vector.load %arg6[%c0_37, %c0_38] : memref<24x128xf32, #tpu.memory_space<vmem>>, vector<24x128xf32>
    %52 = vector.broadcast %50 : f32 to vector<24x128xf32>
    %53 = arith.mulf %52, %51 : vector<24x128xf32>
    %54 = arith.addf %49, %53 : vector<24x128xf32>
    %c2_39 = arith.constant 2 : index
    %c2_40 = arith.constant 2 : index
    %55 = memref.load %arg1[%c2_39, %c2_40] : memref<4x3xf32, #tpu.memory_space<smem>>
    %c0_41 = arith.constant 0 : index
    %c0_42 = arith.constant 0 : index
    %56 = vector.load %arg7[%c0_41, %c0_42] : memref<24x128xf32, #tpu.memory_space<vmem>>, vector<24x128xf32>
    %57 = vector.broadcast %55 : f32 to vector<24x128xf32>
    %58 = arith.mulf %57, %56 : vector<24x128xf32>
    %59 = arith.addf %54, %58 : vector<24x128xf32>
    %c2_43 = arith.constant 2 : index
    %60 = memref.load %arg2[%c2_43] : memref<4xf32, #tpu.memory_space<smem>>
    %61 = vector.broadcast %60 : f32 to vector<24x128xf32>
    %62 = arith.addf %59, %61 : vector<24x128xf32>
    %cst_44 = arith.constant 0.000000e+00 : f32
    %63 = vector.broadcast %cst_44 : f32 to vector<24x128xf32>
    %64 = arith.maximumf %62, %63 : vector<24x128xf32>
    %c0_45 = arith.constant 0 : index
    %c2_46 = arith.constant 2 : index
    %65 = vector.load %arg4[%c0_45, %c2_46] : memref<128x4xf32, #tpu.memory_space<vmem>>, vector<128x1xf32>
    %cst_47 = arith.constant dense<0.000000e+00> : vector<24x1xf32>
    %66 = tpu.matmul %64, %65, %cst_47 {dimension_numbers = #tpu.dot_dimension_numbers<[1], [0], [0], [1], [0, 0, 1, 1], [], []>} : vector<24x128xf32>, vector<128x1xf32>, vector<24x1xf32> -> vector<24x1xf32>
    %67 = arith.addf %45, %66 : vector<24x1xf32>
    %c3 = arith.constant 3 : index
    %c0_48 = arith.constant 0 : index
    %68 = memref.load %arg1[%c3, %c0_48] : memref<4x3xf32, #tpu.memory_space<smem>>
    %c0_49 = arith.constant 0 : index
    %c0_50 = arith.constant 0 : index
    %69 = vector.load %arg5[%c0_49, %c0_50] : memref<24x128xf32, #tpu.memory_space<vmem>>, vector<24x128xf32>
    %70 = vector.broadcast %68 : f32 to vector<24x128xf32>
    %71 = arith.mulf %70, %69 : vector<24x128xf32>
    %c3_51 = arith.constant 3 : index
    %c1_52 = arith.constant 1 : index
    %72 = memref.load %arg1[%c3_51, %c1_52] : memref<4x3xf32, #tpu.memory_space<smem>>
    %c0_53 = arith.constant 0 : index
    %c0_54 = arith.constant 0 : index
    %73 = vector.load %arg6[%c0_53, %c0_54] : memref<24x128xf32, #tpu.memory_space<vmem>>, vector<24x128xf32>
    %74 = vector.broadcast %72 : f32 to vector<24x128xf32>
    %75 = arith.mulf %74, %73 : vector<24x128xf32>
    %76 = arith.addf %71, %75 : vector<24x128xf32>
    %c3_55 = arith.constant 3 : index
    %c2_56 = arith.constant 2 : index
    %77 = memref.load %arg1[%c3_55, %c2_56] : memref<4x3xf32, #tpu.memory_space<smem>>
    %c0_57 = arith.constant 0 : index
    %c0_58 = arith.constant 0 : index
    %78 = vector.load %arg7[%c0_57, %c0_58] : memref<24x128xf32, #tpu.memory_space<vmem>>, vector<24x128xf32>
    %79 = vector.broadcast %77 : f32 to vector<24x128xf32>
    %80 = arith.mulf %79, %78 : vector<24x128xf32>
    %81 = arith.addf %76, %80 : vector<24x128xf32>
    %c3_59 = arith.constant 3 : index
    %82 = memref.load %arg2[%c3_59] : memref<4xf32, #tpu.memory_space<smem>>
    %83 = vector.broadcast %82 : f32 to vector<24x128xf32>
    %84 = arith.addf %81, %83 : vector<24x128xf32>
    %cst_60 = arith.constant 0.000000e+00 : f32
    %85 = vector.broadcast %cst_60 : f32 to vector<24x128xf32>
    %86 = arith.maximumf %84, %85 : vector<24x128xf32>
    %c0_61 = arith.constant 0 : index
    %c3_62 = arith.constant 3 : index
    %87 = vector.load %arg4[%c0_61, %c3_62] : memref<128x4xf32, #tpu.memory_space<vmem>>, vector<128x1xf32>
    %cst_63 = arith.constant dense<0.000000e+00> : vector<24x1xf32>
    %88 = tpu.matmul %86, %87, %cst_63 {dimension_numbers = #tpu.dot_dimension_numbers<[1], [0], [0], [1], [0, 0, 1, 1], [], []>} : vector<24x128xf32>, vector<128x1xf32>, vector<24x1xf32> -> vector<24x1xf32>
    %89 = arith.addf %67, %88 : vector<24x1xf32>
    %c0_64 = arith.constant 0 : index
    %c0_65 = arith.constant 0 : index
    %90 = vector.load %arg8[%c0_64, %c0_65] : memref<24x1xf32, #tpu.memory_space<vmem>>, vector<24x1xf32>
    tpu.vector_store %arg8[%c0_64, %c0_65], %89 {strides = array<i32>} : memref<24x1xf32, #tpu.memory_space<vmem>>, vector<24x1xf32>,
    return
  }
  func.func @transform_0(%arg0: i32) -> (i32, i32) {
    %c0_i32 = arith.constant 0 : i32
    %c0_i32_0 = arith.constant 0 : i32
    %c0_i32_1 = arith.constant 0 : i32
    return %c0_i32, %c0_i32_0 : i32, i32
  }
  func.func @transform_1(%arg0: i32) -> i32 {
    %c0_i32 = arith.constant 0 : i32
    %c0_i32_0 = arith.constant 0 : i32
    return %c0_i32 : i32
  }
  func.func @transform_2(%arg0: i32) -> i32 {
    %c0_i32 = arith.constant 0 : i32
    %c0_i32_0 = arith.constant 0 : i32
    return %c0_i32 : i32
  }
  func.func @transform_3(%arg0: i32) -> (i32, i32) {
    %c0_i32 = arith.constant 0 : i32
    %c0_i32_0 = arith.constant 0 : i32
    %c0_i32_1 = arith.constant 0 : i32
    return %c0_i32, %c0_i32_0 : i32, i32
  }
  func.func @transform_4(%arg0: i32) -> (i32, i32) {
    %c0_i32 = arith.constant 0 : i32
    %c0_i32_0 = arith.constant 0 : i32
    return %arg0, %c0_i32 : i32, i32
  }
  func.func @transform_5(%arg0: i32) -> (i32, i32) {
    %c0_i32 = arith.constant 0 : i32
    %c0_i32_0 = arith.constant 0 : i32
    return %arg0, %c0_i32 : i32, i32
  }
  func.func @transform_6(%arg0: i32) -> (i32, i32) {
    %c0_i32 = arith.constant 0 : i32
    %c0_i32_0 = arith.constant 0 : i32
    return %arg0, %c0_i32 : i32, i32
  }
  func.func @transform_7(%arg0: i32) -> (i32, i32) {
    %c0_i32 = arith.constant 0 : i32
    %c0_i32_0 = arith.constant 0 : i32
    return %arg0, %c0_i32 : i32, i32
  }
}

</mosaic_0001>

<bundles_post_ra>
// kernel: tpu_custom_call.1
= control target key start
LH: loop header
LB: loop body
LE: loop exit
PB: predicated region body
PF: predicated region fallthrough
CT: control target
= control target key end

     0   :  { %13 = vsyncpa [#allocation4], 0  ;;  %s1483_s0 = inlined_call_operand.vmem [shape: f32[4,3], index: 0, kind: input, shape index: {}]   ;;  %s1484_s1 = inlined_call_operand.vmem [shape: f32[4], index: 1, kind: input, shape index: {}]   ;;  %s1485_s2 = inlined_call_operand.<no memory space> [shape: f32[1], index: 2, kind: input, shape index: {}]   ;;  %s1486_s3 = inlined_call_operand.vmem [shape: f32[128,4], index: 3, kind: input, shape index: {}]   ;;  %s1487_s4 = inlined_call_operand.vmem [shape: f32[24,128], index: 4, kind: input, shape index: {}]   ;;  %s1488_s5 = inlined_call_operand.vmem [shape: f32[24,128], index: 5, kind: input, shape index: {}]   ;;  %s1489_s6 = inlined_call_operand.vmem [shape: f32[24,128], index: 6, kind: input, shape index: {}]   ;;  %s1490_s7 = inlined_call_operand.vmem [shape: f32[24,1], index: 7, kind: output, shape index: {}]  }
   0x1   :  { %s21_s26 = sshll.u32 %s1483_s0, 4  ;;  %s22_s26 = int_to_ptr.vmem [resolvable:$true] %s21_s26 }
   0x2   :  { %14 = vsyncpa [#allocation6], 0  ;;  %s31_s29 = sshll.u32 %s1484_s1, 4  ;;  %s958_s30 = scalar_lea.vmem %s22_s26, 64  ;;  %s32_s29 = int_to_ptr.vmem [resolvable:$true] %s31_s29 }
   0x3   :  { %p959_p0 = scmp.ne.s32.totalorder %s22_s26, %s958_s30  ;;  %p963_p1 = scmp.lt.s32.totalorder %s22_s26, %s22_s26 }
   0x4   :  { %p964_p2 = scmp.lt.s32.totalorder %s958_s30, %s958_s30 }
   0x6   :  { %p965_p3 = por %p964_p2, %p963_p1 }
   0x8   :  { %p966_p4 = pnand %p965_p3, %p959_p0 }
   0xa   :  { %969 = shalt.err (!%p966_p4)
}
   0xb   :  { %s986_s8 = smov [#allocation3]   ;;  %s970_s9 = scalar_lea.vmem %s32_s29, 16 }
   0xc   :  { %24 = dma.vmem_to_smem %s22_s26, 64, %s986_s8, [#allocation4]  }
   0xd   :  { %p971_p5 = scmp.ne.s32.totalorder %s32_s29, %s970_s9  ;;  %p975_p6 = scmp.lt.s32.totalorder %s32_s29, %s32_s29 }
   0xe   :  { %p976_p7 = scmp.lt.s32.totalorder %s970_s9, %s970_s9 }
  0x10   :  { %p977_p8 = por %p976_p7, %p975_p6 }
  0x12   :  { %p978_p9 = pnand %p977_p8, %p971_p5 }
  0x14   :  { %981 = shalt.err (!%p978_p9)
}
  0x15   :  { %s987_s0 = smov [#allocation5]  }
  0x16   :  { %34 = dma.vmem_to_smem %s32_s29, 16, %s987_s0, [#allocation6]  }
  0x17   :  { %982 = dma.done.wait [#allocation4], 64  }
  0x18   :  { %983 = vsyncadd [#allocation4], 4294967232 }
  0x19   :  { %984 = dma.done.wait [#allocation6], 16  }
  0x1a   :  { %985 = vsyncadd [#allocation6], 4294967280 }
  0x1b   :  { %51 = sfence }
  0x1c   :  { %v1042_v0 = vld [vmem:[%s1486_s3 + $0x78] sm:$0xff]  ;;  %v1047_v1 = vld [vmem:[%s1486_s3 + $0x68] sm:$0xff]  ;;  %s988_s13 = smov 127   ;;  %v1056_v2 = vld [vmem:[%s1486_s3 + $0x70] sm:$0xff]  ;;  %v989_v4 = vmov 0.0   ;;  %s699_s22 = sld [smem:[#allocation3 + $0x80]] }
  0x1d   :  { %266 = vrot.lane.b32.xlu0 %v1042_v0, %s988_s13  ;;  %262 = vrot.lane.b32.xlu1 %v1047_v1, %s988_s13  ;;  %v1061_v3 = vld [vmem:[%s1486_s3 + $0x60] sm:$0xff]  ;;  %v1074_v5 = vld [vmem:[%s1486_s3 + $0x58] sm:$0xff]  ;;  %s700_s23 = sld [smem:[#allocation3 + $0x81]]  ;;  %vm990_vm0 = vmmov 0   ;;  %vm687_vm1 = vcmask 7168  }
  0x1e   :  { %787 = vmatprep.subr.mxu0 %v989_v4  ;;  %828 = vmatprep.subr.mxu1 %v989_v4  ;;  %v1079_v6 = vld [vmem:[%s1486_s3 + $0x50] sm:$0xff]  ;;  %v1091_v7 = vld [vmem:[%s1486_s3 + $0x48] sm:$0xff]  ;;  %v1096_v8 = vld [vmem:[%s1486_s3 + $0x40] sm:$0xff]  ;;  %s701_s28 = sld [smem:[#allocation3 + $0x82]] }
  0x1f   :  { %788 = vmatpush3.msra.mxu0 %v1042_v0  ;;  %s1101_s29 = sld [smem:[#allocation3]]  ;;  %v1110_v9 = vld [vmem:[%s1487_s4] sm:$0xff]  ;;  %v1119_v11 = vld [vmem:[%s1486_s3 + $0x38] sm:$0xff]  ;;  %v1124_v12 = vld [vmem:[%s1486_s3 + $0x30] sm:$0xff]  ;;  %819 = vmatprep.mubr.msk.f32.mxu0 %vm990_vm0, %v989_v4 }
  0x20   :  { %789 = vmatprep.subr.mxu0 %v989_v4  ;;  %s1112_s9 = sld [smem:[#allocation3 + $0x1]]  ;;  %v1130_v13 = vld [vmem:[%s1488_s5] sm:$0xff]  ;;  %v1156_v21 = vld [vmem:[%s1486_s3 + $0x28] sm:$0xff]  ;;  %860 = vmatprep.mubr.msk.f32.mxu1 %vm990_vm0, %v989_v4  ;;  %v1185_v26 = vld [vmem:[%s1486_s3 + $0x18] sm:$0xff] }
  0x21   :  { %264 = vrot.lane.b32.xlu0 %v1056_v2, %s988_s13  ;;  %260 = vrot.lane.b32.xlu1 %v1061_v3, %s988_s13  ;;  %v1143_v17 = vld [vmem:[%s1489_s6] sm:$0xff]  ;;  %s698_s17 = sld [smem:[#allocation3 + $0x2]]  ;;  %v1190_v27 = vld [vmem:[%s1486_s3 + $0x10] sm:$0xff] }
  0x22   :  { %790 = vmatpush3.msra.mxu0 %v1056_v2  ;;  %v1114_v10 = vstv %s699_s22  ;;  %v1161_v22 = vld [vmem:[%s1486_s3 + $0x20] sm:$0xff]  ;;  %s84_s26 = sld [smem:[#allocation5]]  ;;  %v1208_v31 = vld [vmem:[%s1486_s3 + $0x8] sm:$0xff]  ;;  %v1297_v46 = vld [vmem:[%s1487_s4 + $0x10] sm:$0xff] }
  0x23   :  { %791 = vmatprep.subr.mxu0 %v989_v4  ;;  %v193_v14 = vmul.f32 %v1114_v10, %v1110_v9  ;;  %v1134_v15 = vstv %s700_s23  ;;  %v1213_v32 = vld [vmem:[%s1486_s3] sm:$0xff]  ;;  %s991_s3 = smov 126   ;;  %v1272_v39 = vld [vmem:[%s1487_s4 + $0x8] sm:$0xff]  ;;  %s703_s12 = sld [smem:[#allocation3 + $0x100]]  ;;  %v1302_v47 = vld [vmem:[%s1488_s5 + $0x10] sm:$0xff]  ;;  %v195_v62 = vmul.f32 %v1114_v10, %v1297_v46 }
  0x24   :  { %792 = vmatpush3.msra.mxu0 %v1047_v1  ;;  %v198_v16 = vmul.f32 %v1134_v15, %v1130_v13  ;;  %v1145_v18 = vstv %s701_s28  ;;  %v1277_v40 = vld [vmem:[%s1488_s5 + $0x8] sm:$0xff]  ;;  %s704_s14 = sld [smem:[#allocation3 + $0x101]]  ;;  %v194_v51 = vmul.f32 %v1114_v10, %v1272_v39  ;;  %v1313_v52 = vld [vmem:[%s1489_s6 + $0x10] sm:$0xff]  ;;  %v200_v63 = vmul.f32 %v1134_v15, %v1302_v47 }
  0x25   :  { %258 = vrot.lane.b32.xlu0 %v1074_v5, %s988_s13  ;;  %256 = vrot.lane.b32.xlu1 %v1079_v6, %s988_s13  ;;  %v206_v20 = vmul.f32 %v1145_v18, %v1143_v17  ;;  %v1177_v24 = vstv %s1101_s29  ;;  %v1286_v43 = vld [vmem:[%s1489_s6 + $0x8] sm:$0xff]  ;;  %s705_s19 = sld [smem:[#allocation3 + $0x102]]  ;;  %v199_v53 = vmul.f32 %v1134_v15, %v1277_v40 }
  0x26   :  { %793 = vmatprep.subr.mxu0 %v989_v4  ;;  %v201_v19 = vadd.f32 %v198_v16, %v193_v14  ;;  %v1180_v25 = vstv %s1112_s9  ;;  %v59_v28 = vmul.f32 %v1177_v24, %v1110_v9  ;;  %v60_v41 = vmul.f32 %v1177_v24, %v1272_v39  ;;  %s707_s4 = sld [smem:[#allocation3 + $0x180]] }
  0x27   :  { %794 = vmatpush3.msra.mxu0 %v1061_v3  ;;  %v67_v29 = vmul.f32 %v1180_v25, %v1130_v13  ;;  %v1203_v30 = vstv %s698_s17  ;;  %v68_v42 = vmul.f32 %v1180_v25, %v1277_v40  ;;  %v61_v49 = vmul.f32 %v1177_v24, %v1297_v46  ;;  %s708_s5 = sld [smem:[#allocation3 + $0x181]] }
  0x28   :  { %795 = vmatprep.subr.mxu0 %v989_v4  ;;  %v1167_v23 = vadd.f32 %v206_v20, %v201_v19  ;;  %v78_v34 = vmul.f32 %v1203_v30, %v1143_v17  ;;  %v1231_v36 = vstv %s84_s26  ;;  %v79_v45 = vmul.f32 %v1203_v30, %v1286_v43  ;;  %s709_s6 = sld [smem:[#allocation3 + $0x182]] }
  0x29   :  { %254 = vrot.lane.b32.xlu0 %v1091_v7, %s988_s13  ;;  %252 = vrot.lane.b32.xlu1 %v1096_v8, %s988_s13  ;;  %v70_v33 = vadd.f32 %v67_v29, %v59_v28  ;;  %v71_v44 = vadd.f32 %v68_v42, %v60_v41  ;;  %v69_v50 = vmul.f32 %v1180_v25, %v1302_v47  ;;  %v368_v59 = vstv %s703_s12  ;;  %s702_s22 = sld [smem:[#allocation5 + $0x1]] }
  0x2a   :  { %796 = vmatpush3.msra.mxu0 %v1074_v5  ;;  %v80_v56 = vmul.f32 %v1203_v30, %v1313_v52  ;;  %v202_v57 = vadd.f32 %v199_v53, %v194_v51  ;;  %v207_v58 = vmul.f32 %v1145_v18, %v1286_v43  ;;  %v370_v15 = vmul.f32 %v368_v59, %v1272_v39  ;;  %s706_s23 = sld [smem:[#allocation5 + $0x2]] }
  0x2b   :  { %797 = vmatprep.subr.mxu0 %v989_v4  ;;  %v81_v35 = vadd.f32 %v78_v34, %v70_v33  ;;  %v82_v48 = vadd.f32 %v79_v45, %v71_v44  ;;  %v72_v55 = vadd.f32 %v69_v50, %v61_v49  ;;  %s710_s24 = sld [smem:[#allocation5 + $0x3]] }
  0x2c   :  { %798 = vmatpush3.msra.mxu0 %v1079_v6  ;;  %v528_v24 = vstv %s707_s4 }
  0x2d   :  { %250 = vrot.lane.b32.xlu0 %v1119_v11, %s988_s13  ;;  %248 = vrot.lane.b32.xlu1 %v1124_v12, %s988_s13  ;;  %v86_v37 = vadd.f32 %v1231_v36, %v81_v35  ;;  %v87_v54 = vadd.f32 %v1231_v36, %v82_v48  ;;  %v83_v61 = vadd.f32 %v80_v56, %v72_v55  ;;  %v533_v29 = vstv %s708_s5 }
  0x2e   :  { %799 = vmatprep.subr.mxu0 %v989_v4  ;;  %v529_v28 = vmul.f32 %v528_v24, %v1110_v9  ;;  %v541_v33 = vstv %s709_s6  ;;  %v371_v35 = vmul.f32 %v368_v59, %v1297_v46  ;;  %v530_v41 = vmul.f32 %v528_v24, %v1272_v39 }
  0x2f   :  { %800 = vmatpush3.msra.mxu0 %v1091_v7  ;;  %v89_v38 = vmax.f32 %v86_v37, 0.0  ;;  %v90_v60 = vmax.f32 %v87_v54, 0.0  ;;  %v542_v34 = vmul.f32 %v541_v33, %v1143_v17  ;;  %v543_v42 = vmul.f32 %v541_v33, %v1286_v43 }
  0x30   :  { %801 = vmatprep.subr.mxu0 %v989_v4  ;;  %v531_v45 = vmul.f32 %v528_v24, %v1297_v46  ;;  %v536_v48 = vmul.f32 %v533_v29, %v1302_v47  ;;  %v544_v49 = vmul.f32 %v541_v33, %v1313_v52 }
  0x31   :  { %246 = vrot.lane.b32.xlu0 %v1156_v21, %s988_s13  ;;  %244 = vrot.lane.b32.xlu1 %v1161_v22, %s988_s13 }
  0x32   :  { %802 = vmatpush3.msra.mxu0 %v1096_v8 }
  0x33   :  { %803 = vmatprep.subr.mxu0 %v989_v4 }
  0x34   :  { %804 = vmatpush3.msra.mxu0 %v1119_v11 }
  0x35   :  { %242 = vrot.lane.b32.xlu0 %v1185_v26, %s988_s13  ;;  %240 = vrot.lane.b32.xlu1 %v1190_v27, %s988_s13 }
  0x36   :  { %805 = vmatprep.subr.mxu0 %v989_v4 }
  0x37   :  { %806 = vmatpush3.msra.mxu0 %v1124_v12 }
  0x38   :  { %807 = vmatprep.subr.mxu0 %v989_v4 }
  0x39   :  { %238 = vrot.lane.b32.xlu0 %v1208_v31, %s988_s13  ;;  %236 = vrot.lane.b32.xlu1 %v1213_v32, %s988_s13  ;;  %s992_s13 = smov 125  }
  0x3a   :  { %808 = vmatpush3.msra.mxu0 %v1156_v21 }
  0x3b   :  { %809 = vmatprep.subr.mxu0 %v989_v4 }
  0x3c   :  { %810 = vmatpush3.msra.mxu0 %v1161_v22 }
  0x3d   :  { %426 = vrot.lane.b32.xlu0 %v1042_v0, %s991_s3  ;;  %424 = vrot.lane.b32.xlu1 %v1056_v2, %s991_s3 }
  0x3e   :  { %811 = vmatprep.subr.mxu0 %v989_v4 }
  0x3f   :  { %812 = vmatpush3.msra.mxu0 %v1185_v26 }
  0x40   :  { %813 = vmatprep.subr.mxu0 %v989_v4 }
  0x41   :  { %586 = vrot.lane.b32.xlu0 %v1042_v0, %s992_s13  ;;  %422 = vrot.lane.b32.xlu1 %v1047_v1, %s991_s3  ;;  %v1330_v0 = vadd.f32 %v207_v58, %v202_v57  ;;  %v213_v57 = vstv %s702_s22 }
  0x42   :  { %814 = vmatpush3.msra.mxu0 %v1190_v27  ;;  %v214_v58 = vadd.f32 %v213_v57, %v1167_v23 }
  0x43   :  { %815 = vmatprep.subr.mxu0 %v989_v4 }
  0x44   :  { %816 = vmatpush3.msra.mxu0 %v1208_v31 }
  0x45   :  { %584 = vrot.lane.b32.xlu0 %v1056_v2, %s992_s13  ;;  %420 = vrot.lane.b32.xlu1 %v1061_v3, %s991_s3  ;;  %v373_v2 = vstv %s704_s14 }
  0x46   :  { %817 = vmatprep.subr.mxu0 %v989_v4  ;;  %v375_v16 = vmul.f32 %v373_v2, %v1277_v40 }
  0x47   :  { %818 = vmatpush3.msra.mxu0 %v1213_v32 }
  0x48   :  { %869 = vmatprep.subr.mxu0 %v989_v4  ;;  %820 = vmatmul.mubr.f32.vlgmr.msra.gmra.mxu0 %v89_v38 }
  0x49   :  { %582 = vrot.lane.b32.xlu0 %v1047_v1, %s992_s13  ;;  %418 = vrot.lane.b32.xlu1 %v1074_v5, %s991_s3  ;;  %v369_v1 = vmul.f32 %v368_v59, %v1110_v9 }
  0x4a   :  { %822 = vmatprep.mubr.msk.f32.mxu0 %vm990_vm0, %v989_v4 }
  0x4c   :  { %823 = vmatmul.mubr.f32.gmra.mxu0 %v90_v60 }
  0x4d   :  { %580 = vrot.lane.b32.xlu0 %v1061_v3, %s992_s13  ;;  %416 = vrot.lane.b32.xlu1 %v1079_v6, %s991_s3  ;;  %v381_v3 = vstv %s705_s19 }
  0x4e   :  { %v382_v10 = vmul.f32 %v381_v3, %v1143_v17  ;;  %825 = vmatprep.mubr.msk.f32.mxu0 %vm990_vm0, %v989_v4  ;;  %v383_v20 = vmul.f32 %v381_v3, %v1286_v43  ;;  %v384_v37 = vmul.f32 %v381_v3, %v1313_v52  ;;  %v535_v17 = vmul.f32 %v533_v29, %v1277_v40 }
  0x4f   :  { %v539_v40 = vadd.f32 %v536_v48, %v531_v45  ;;  %v549_v45 = vstv %s710_s24 }
  0x51   :  { %578 = vrot.lane.b32.xlu0 %v1074_v5, %s992_s13  ;;  %414 = vrot.lane.b32.xlu1 %v1091_v7, %s991_s3  ;;  %v88_v5 = vadd.f32 %v1231_v36, %v83_v61  ;;  %v376_v36 = vmul.f32 %v373_v2, %v1302_v47  ;;  %v217_v61 = vmax.f32 %v214_v58, 0.0 }
  0x53   :  { %v91_v14 = vmax.f32 %v88_v5, 0.0  ;;  %v379_v38 = vadd.f32 %v376_v36, %v371_v35 }
  0x55   :  { %576 = vrot.lane.b32.xlu0 %v1079_v6, %s992_s13  ;;  %412 = vrot.lane.b32.xlu1 %v1096_v8, %s991_s3  ;;  %v203_v6 = vadd.f32 %v200_v63, %v195_v62  ;;  %v1374_v44 = vadd.f32 %v384_v37, %v379_v38  ;;  %v215_v62 = vadd.f32 %v213_v57, %v1330_v0  ;;  %v389_v37 = vstv %s706_s23 }
  0x56   :  { %826 = vmatmul.mubr.f32.gmra.mxu0 %v91_v14 }
  0x57   :  { %901 = vmatprep.mubr.msk.f32.mxu0 %vm990_vm0, %v989_v4  ;;  %v218_v23 = vmax.f32 %v215_v62, 0.0 }
  0x59   :  { %574 = vrot.lane.b32.xlu0 %v1091_v7, %s992_s13  ;;  %410 = vrot.lane.b32.xlu1 %v1119_v11, %s991_s3  ;;  %v208_v7 = vmul.f32 %v1145_v18, %v1313_v52  ;;  %v378_v18 = vadd.f32 %v375_v16, %v370_v15 }
  0x5b   :  { %v1358_v30 = vadd.f32 %v383_v20, %v378_v18 }
  0x5d   :  { %572 = vrot.lane.b32.xlu0 %v1096_v8, %s992_s13  ;;  %408 = vrot.lane.b32.xlu1 %v1124_v12, %s991_s3  ;;  %v374_v8 = vmul.f32 %v373_v2, %v1130_v13 }
  0x5f   :  { %v377_v19 = vadd.f32 %v374_v8, %v369_v1 }
  0x61   :  { %570 = vrot.lane.b32.xlu0 %v1119_v11, %s992_s13  ;;  %406 = vrot.lane.b32.xlu1 %v1156_v21, %s991_s3  ;;  %v1344_v11 = vadd.f32 %v208_v7, %v203_v6  ;;  %v1353_v25 = vadd.f32 %v382_v10, %v377_v19 }
  0x63   :  { %v216_v2 = vadd.f32 %v213_v57, %v1344_v11 }
  0x65   :  { %568 = vrot.lane.b32.xlu0 %v1124_v12, %s992_s13  ;;  %404 = vrot.lane.b32.xlu1 %v1161_v22, %s991_s3  ;;  %v534_v12 = vmul.f32 %v533_v29, %v1130_v13  ;;  %v219_v0 = vmax.f32 %v216_v2, 0.0 }
  0x67   :  { %v537_v9 = vadd.f32 %v534_v12, %v529_v28 }
  0x69   :  { %566 = vrot.lane.b32.xlu0 %v1156_v21, %s992_s13  ;;  %402 = vrot.lane.b32.xlu1 %v1185_v26, %s991_s3  ;;  %v1370_v13 = vadd.f32 %v542_v34, %v537_v9  ;;  %v538_v21 = vadd.f32 %v535_v17, %v530_v41  ;;  %v390_v17 = vadd.f32 %v389_v37, %v1353_v25 }
  0x6b   :  { %v1382_v39 = vadd.f32 %v543_v42, %v538_v21  ;;  %v393_v48 = vmax.f32 %v390_v17, 0.0 }
  0x6d   :  { %564 = vrot.lane.b32.xlu0 %v1161_v22, %s992_s13  ;;  %400 = vrot.lane.b32.xlu1 %v1190_v27, %s991_s3  ;;  %v1389_v22 = vadd.f32 %v544_v49, %v539_v40  ;;  %v391_v49 = vadd.f32 %v389_v37, %v1358_v30  ;;  %v551_v30 = vadd.f32 %v549_v45, %v1382_v39 }
  0x6f   :  { %v394_v25 = vmax.f32 %v391_v49, 0.0 }
  0x71   :  { %562 = vrot.lane.b32.xlu0 %v1185_v26, %s992_s13  ;;  %398 = vrot.lane.b32.xlu1 %v1208_v31, %s991_s3 }
  0x75   :  { %560 = vrot.lane.b32.xlu0 %v1190_v27, %s992_s13  ;;  %396 = vrot.lane.b32.xlu1 %v1213_v32, %s991_s3 }
  0x79   :  { %558 = vrot.lane.b32.xlu0 %v1208_v31, %s992_s13  ;;  %556 = vrot.lane.b32.xlu1 %v1213_v32, %s992_s13 }
  0x8f   :  { %v267_v43 = vpop.permute.xlu0 %266  ;;  %v263_v46 = vpop.permute.xlu1 %262 }
  0x90   :  { %829 = vmatpush3.msra.mxu1 %v267_v43 }
  0x91   :  { %830 = vmatprep.subr.mxu1 %v989_v4 }
  0x93   :  { %v265_v26 = vpop.permute.xlu0 %264  ;;  %v261_v47 = vpop.permute.xlu1 %260 }
  0x94   :  { %831 = vmatpush3.msra.mxu1 %v265_v26  ;;  %v392_v26 = vadd.f32 %v389_v37, %v1374_v44  ;;  %v552_v44 = vadd.f32 %v549_v45, %v1389_v22 }
  0x95   :  { %832 = vmatprep.subr.mxu1 %v989_v4 }
  0x96   :  { %833 = vmatpush3.msra.mxu1 %v263_v46  ;;  %v550_v46 = vadd.f32 %v549_v45, %v1370_v13  ;;  %v395_v13 = vmax.f32 %v392_v26, 0.0 }
  0x97   :  { %834 = vmatprep.subr.mxu1 %v989_v4  ;;  %v259_v27 = vpop.permute.xlu0 %258  ;;  %v257_v50 = vpop.permute.xlu1 %256 }
  0x98   :  { %835 = vmatpush3.msra.mxu1 %v261_v47 }
  0x99   :  { %836 = vmatprep.subr.mxu1 %v989_v4 }
  0x9a   :  { %837 = vmatpush3.msra.mxu1 %v259_v27 }
  0x9b   :  { %838 = vmatprep.subr.mxu1 %v989_v4  ;;  %v255_v31 = vpop.permute.xlu0 %254  ;;  %v253_v32 = vpop.permute.xlu1 %252 }
  0x9c   :  { %839 = vmatpush3.msra.mxu1 %v257_v50  ;;  %v553_v50 = vmax.f32 %v550_v46, 0.0 }
  0x9d   :  { %840 = vmatprep.subr.mxu1 %v989_v4 }
  0x9e   :  { %841 = vmatpush3.msra.mxu1 %v255_v31  ;;  %v554_v31 = vmax.f32 %v551_v30, 0.0 }
  0x9f   :  { %842 = vmatprep.subr.mxu1 %v989_v4  ;;  %v251_v51 = vpop.permute.xlu0 %250  ;;  %v249_v52 = vpop.permute.xlu1 %248 }
  0xa0   :  { %843 = vmatpush3.msra.mxu1 %v253_v32  ;;  %v555_v32 = vmax.f32 %v552_v44, 0.0 }
  0xa1   :  { %844 = vmatprep.subr.mxu1 %v989_v4 }
  0xa2   :  { %845 = vmatpush3.msra.mxu1 %v251_v51 }
  0xa3   :  { %846 = vmatprep.subr.mxu1 %v989_v4  ;;  %v247_v53 = vpop.permute.xlu0 %246  ;;  %v245_v54 = vpop.permute.xlu1 %244 }
  0xa4   :  { %847 = vmatpush3.msra.mxu1 %v249_v52 }
  0xa5   :  { %848 = vmatprep.subr.mxu1 %v989_v4 }
  0xa6   :  { %849 = vmatpush3.msra.mxu1 %v247_v53 }
  0xa7   :  { %850 = vmatprep.subr.mxu1 %v989_v4  ;;  %v243_v55 = vpop.permute.xlu0 %242  ;;  %v241_v56 = vpop.permute.xlu1 %240 }
  0xa8   :  { %851 = vmatpush3.msra.mxu1 %v245_v54 }
  0xa9   :  { %852 = vmatprep.subr.mxu1 %v989_v4 }
  0xaa   :  { %853 = vmatpush3.msra.mxu1 %v243_v55 }
  0xab   :  { %854 = vmatprep.subr.mxu1 %v989_v4  ;;  %v239_v59 = vpop.permute.xlu0 %238  ;;  %v237_v60 = vpop.permute.xlu1 %236 }
  0xac   :  { %855 = vmatpush3.msra.mxu1 %v241_v56 }
  0xad   :  { %856 = vmatprep.subr.mxu1 %v989_v4 }
  0xae   :  { %857 = vmatpush3.msra.mxu1 %v239_v59 }
  0xaf   :  { %858 = vmatprep.subr.mxu1 %v989_v4  ;;  %v427_v63 = vpop.permute.xlu0 %426  ;;  %v425_v1 = vpop.permute.xlu1 %424 }
  0xb0   :  { %859 = vmatpush3.msra.mxu1 %v237_v60  ;;  %870 = vmatpush3.msra.mxu0 %v427_v63 }
  0xb1   :  { %871 = vmatprep.subr.mxu0 %v989_v4  ;;  %910 = vmatprep.subr.mxu1 %v989_v4 }
  0xb2   :  { %872 = vmatpush3.msra.mxu0 %v425_v1  ;;  %861 = vmatmul.mubr.f32.vlgmr.msra.gmra.mxu1 %v217_v61  ;;  %v53_v61 = vstv %s1485_s2 }
  0xb3   :  { %v587_v3 = vpop.permute.xlu0 %586  ;;  %v423_v5 = vpop.permute.xlu1 %422  ;;  %873 = vmatprep.subr.mxu0 %v989_v4  ;;  %863 = vmatprep.mubr.msk.f32.mxu1 %vm990_vm0, %v989_v4 }
  0xb4   :  { %911 = vmatpush3.msra.mxu1 %v587_v3  ;;  %874 = vmatpush3.msra.mxu0 %v423_v5 }
  0xb5   :  { %912 = vmatprep.subr.mxu1 %v989_v4  ;;  %875 = vmatprep.subr.mxu0 %v989_v4 }
  0xb6   :  { %864 = vmatmul.mubr.f32.gmra.mxu1 %v218_v23 }
  0xb7   :  { %v585_v6 = vpop.permute.xlu0 %584  ;;  %v421_v7 = vpop.permute.xlu1 %420  ;;  %866 = vmatprep.mubr.msk.f32.mxu1 %vm990_vm0, %v989_v4 }
  0xb8   :  { %913 = vmatpush3.msra.mxu1 %v585_v6  ;;  %876 = vmatpush3.msra.mxu0 %v421_v7 }
  0xb9   :  { %914 = vmatprep.subr.mxu1 %v989_v4  ;;  %877 = vmatprep.subr.mxu0 %v989_v4 }
  0xba   :  { %867 = vmatmul.mubr.f32.gmra.mxu1 %v219_v0 }
  0xbb   :  { %v583_v8 = vpop.permute.xlu0 %582  ;;  %v419_v10 = vpop.permute.xlu1 %418  ;;  %942 = vmatprep.mubr.msk.f32.mxu1 %vm990_vm0, %v989_v4 }
  0xbc   :  { %915 = vmatpush3.msra.mxu1 %v583_v8  ;;  %878 = vmatpush3.msra.mxu0 %v419_v10 }
  0xbd   :  { %916 = vmatprep.subr.mxu1 %v989_v4  ;;  %879 = vmatprep.subr.mxu0 %v989_v4 }
  0xbf   :  { %v581_v14 = vpop.permute.xlu0 %580  ;;  %v417_v11 = vpop.permute.xlu1 %416 }
  0xc0   :  { %917 = vmatpush3.msra.mxu1 %v581_v14  ;;  %880 = vmatpush3.msra.mxu0 %v417_v11 }
  0xc1   :  { %918 = vmatprep.subr.mxu1 %v989_v4  ;;  %881 = vmatprep.subr.mxu0 %v989_v4 }
  0xc3   :  { %v579_v15 = vpop.permute.xlu0 %578  ;;  %v415_v16 = vpop.permute.xlu1 %414 }
  0xc4   :  { %919 = vmatpush3.msra.mxu1 %v579_v15  ;;  %882 = vmatpush3.msra.mxu0 %v415_v16 }
  0xc5   :  { %920 = vmatprep.subr.mxu1 %v989_v4  ;;  %883 = vmatprep.subr.mxu0 %v989_v4 }
  0xc7   :  { %v577_v19 = vpop.permute.xlu0 %576  ;;  %v413_v18 = vpop.permute.xlu1 %412 }
  0xc8   :  { %921 = vmatpush3.msra.mxu1 %v577_v19  ;;  %884 = vmatpush3.msra.mxu0 %v413_v18 }
  0xc9   :  { %922 = vmatprep.subr.mxu1 %v989_v4  ;;  %885 = vmatprep.subr.mxu0 %v989_v4 }
  0xcb   :  { %v575_v20 = vpop.permute.xlu0 %574  ;;  %v411_v24 = vpop.permute.xlu1 %410 }
  0xcc   :  { %923 = vmatpush3.msra.mxu1 %v575_v20  ;;  %886 = vmatpush3.msra.mxu0 %v411_v24 }
  0xcd   :  { %924 = vmatprep.subr.mxu1 %v989_v4  ;;  %887 = vmatprep.subr.mxu0 %v989_v4 }
  0xcf   :  { %v573_v28 = vpop.permute.xlu0 %572  ;;  %v409_v29 = vpop.permute.xlu1 %408 }
  0xd0   :  { %925 = vmatpush3.msra.mxu1 %v573_v28  ;;  %888 = vmatpush3.msra.mxu0 %v409_v29 }
  0xd1   :  { %926 = vmatprep.subr.mxu1 %v989_v4  ;;  %889 = vmatprep.subr.mxu0 %v989_v4 }
  0xd3   :  { %v571_v12 = vpop.permute.xlu0 %570  ;;  %v407_v33 = vpop.permute.xlu1 %406 }
  0xd4   :  { %927 = vmatpush3.msra.mxu1 %v571_v12  ;;  %890 = vmatpush3.msra.mxu0 %v407_v33 }
  0xd5   :  { %928 = vmatprep.subr.mxu1 %v989_v4  ;;  %891 = vmatprep.subr.mxu0 %v989_v4 }
  0xd7   :  { %v569_v34 = vpop.permute.xlu0 %568  ;;  %v405_v35 = vpop.permute.xlu1 %404 }
  0xd8   :  { %929 = vmatpush3.msra.mxu1 %v569_v34  ;;  %892 = vmatpush3.msra.mxu0 %v405_v35 }
  0xd9   :  { %930 = vmatprep.subr.mxu1 %v989_v4  ;;  %893 = vmatprep.subr.mxu0 %v989_v4 }
  0xdb   :  { %v567_v36 = vpop.permute.xlu0 %566  ;;  %v403_v9 = vpop.permute.xlu1 %402 }
  0xdc   :  { %931 = vmatpush3.msra.mxu1 %v567_v36  ;;  %894 = vmatpush3.msra.mxu0 %v403_v9 }
  0xdd   :  { %932 = vmatprep.subr.mxu1 %v989_v4  ;;  %895 = vmatprep.subr.mxu0 %v989_v4 }
  0xdf   :  { %v565_v38 = vpop.permute.xlu0 %564  ;;  %v401_v41 = vpop.permute.xlu1 %400 }
  0xe0   :  { %933 = vmatpush3.msra.mxu1 %v565_v38  ;;  %896 = vmatpush3.msra.mxu0 %v401_v41 }
  0xe1   :  { %934 = vmatprep.subr.mxu1 %v989_v4  ;;  %897 = vmatprep.subr.mxu0 %v989_v4 }
  0xe3   :  { %v563_v42 = vpop.permute.xlu0 %562  ;;  %v399_v21 = vpop.permute.xlu1 %398 }
  0xe4   :  { %935 = vmatpush3.msra.mxu1 %v563_v42  ;;  %898 = vmatpush3.msra.mxu0 %v399_v21 }
  0xe5   :  { %899 = vmatprep.subr.mxu0 %v989_v4  ;;  %936 = vmatprep.subr.mxu1 %v989_v4 }
  0xe7   :  { %v561_v40 = vpop.permute.xlu0 %560  ;;  %v397_v43 = vpop.permute.xlu1 %396 }
  0xe8   :  { %900 = vmatpush3.msra.mxu0 %v397_v43  ;;  %937 = vmatpush3.msra.mxu1 %v561_v40 }
  0xe9   :  { %902 = vmatmul.mubr.f32.vlgmr.msra.gmra.mxu0 %v393_v48  ;;  %938 = vmatprep.subr.mxu1 %v989_v4 }
  0xea   :  { %904 = vmatprep.mubr.msk.f32.mxu0 %vm990_vm0, %v989_v4 }
  0xeb   :  { %v559_v47 = vpop.permute.xlu0 %558  ;;  %v557_v27 = vpop.permute.xlu1 %556 }
  0xec   :  { %939 = vmatpush3.msra.mxu1 %v559_v47 }
  0xed   :  { %905 = vmatmul.mubr.f32.gmra.mxu0 %v394_v25  ;;  %940 = vmatprep.subr.mxu1 %v989_v4 }
  0xee   :  { %941 = vmatpush3.msra.mxu1 %v557_v27  ;;  %907 = vmatprep.mubr.msk.f32.mxu0 %vm990_vm0, %v989_v4 }
  0xef   :  { %943 = vmatmul.mubr.f32.vlgmr.msra.gmra.mxu1 %v553_v50 }
  0xf0   :  { %945 = vmatprep.mubr.msk.f32.mxu1 %vm990_vm0, %v989_v4 }
  0xf1   :  { %908 = vmatmul.mubr.f32.gmra.mxu0 %v395_v13 }
  0xf3   :  { %946 = vmatmul.mubr.f32.gmra.mxu1 %v554_v31 }
  0xf4   :  { %948 = vmatprep.mubr.msk.f32.mxu1 %vm990_vm0, %v989_v4 }
  0xf7   :  { %949 = vmatmul.mubr.f32.gmra.mxu1 %v555_v32 }
 0x108   :  { %v174_v39 = vpop.f32.mrf.mxu0 }
 0x109   :  { %v188_v62 = vadd.f32 %v174_v39, %v53_v61 }
 0x10a   :  { %v821_v51 = vpop.f32.mrf.mxu0 }
 0x10c   :  { %v179_v52 = vpop.f32.mrf.mxu0 }
 0x10d   :  { %v189_v23 = vadd.f32 %v179_v52, %v53_v61 }
 0x10e   :  { %v824_v53 = vpop.f32.mrf.mxu0 }
 0x116   :  { %v184_v54 = vpop.f32.mrf.mxu0 }
 0x117   :  { %v190_v6 = vadd.f32 %v184_v54, %v53_v61 }
 0x118   :  { %v827_v55 = vpop.f32.mrf.mxu0 }
 0x172   :  { %v350_v56 = vpop.f32.mrf.mxu1 }
 0x173   :  { %v364_v1 = vadd.f32 %v350_v56, %v188_v62 }
 0x174   :  { %v862_v57 = vpop.f32.mrf.mxu1 }
 0x176   :  { %v355_v58 = vpop.f32.mrf.mxu1 }
 0x177   :  { %v365_v7 = vadd.f32 %v355_v58, %v189_v23 }
 0x178   :  { %v865_v22 = vpop.f32.mrf.mxu1 }
 0x17a   :  { %v360_v59 = vpop.f32.mrf.mxu1 }
 0x17b   :  { %v366_v19 = vadd.f32 %v360_v59, %v190_v6 }
 0x17c   :  { %v868_v60 = vpop.f32.mrf.mxu1 }
 0x1a9   :  { %v510_v63 = vpop.f32.mrf.mxu0 }
 0x1aa   :  { %v524_v3 = vadd.f32 %v510_v63, %v364_v1 }
 0x1ab   :  { %v903_v4 = vpop.f32.mrf.mxu0 }
 0x1ad   :  { %v515_v2 = vpop.f32.mrf.mxu0 }
 0x1ae   :  { %v525_v11 = vadd.f32 %v515_v2, %v365_v7 }
 0x1af   :  { %v906_v5 = vpop.f32.mrf.mxu0  ;;  %v670_v0 = vpop.f32.mrf.mxu1 }
 0x1b0   :  { %v684_v8 = vadd.f32 %v670_v0, %v524_v3 }
 0x1b1   :  { %v520_v10 = vpop.f32.mrf.mxu0  ;;  %v944_v14 = vpop.f32.mrf.mxu1 }
 0x1b2   :  { %688 = vst.msk [vmem:[%s1490_s7] sm:$0xff] %vm687_vm1, %v684_v8  ;;  %v526_v24 = vadd.f32 %v520_v10, %v366_v19 }
 0x1b3   :  { %v675_v15 = vpop.f32.mrf.mxu1  ;;  %v909_v16 = vpop.f32.mrf.mxu0 }
 0x1b4   :  { %v685_v18 = vadd.f32 %v675_v15, %v525_v11 }
 0x1b5   :  { %v947_v20 = vpop.f32.mrf.mxu1 }
 0x1b6   :  { %689 = vst.msk [vmem:[%s1490_s7 + $0x8] sm:$0xff] %vm687_vm1, %v685_v18 }
 0x1b7   :  { %v680_v28 = vpop.f32.mrf.mxu1 }
 0x1b8   :  { %v686_v29 = vadd.f32 %v680_v28, %v526_v24 }
 0x1b9   :  { %v950_v12 = vpop.f32.mrf.mxu1 }
 0x1ba   :  { %690 = vst.msk [vmem:[%s1490_s7 + $0x10] sm:$0xff] %vm687_vm1, %v686_v29 }
 0x1bb   :  { %695 = vsyncpa [#allocation4], 1 }
 0x1bc   :  { %696 = vsyncpa [#allocation6], 1 }

</bundles_post_ra>
